<compile_context>
chip_gen: v5e
topology: v5e:2x2
jax: 0.10.0
libtpu: 0.0.40
codegen_flags: <defaults>
</compile_context>

<pallas_src>
import functools
import math

import jax
import jax.numpy as jnp
from jax import lax
from jax.experimental import pallas as pl
from jax.experimental.pallas import tpu as pltpu


def _cdiv(a, b):
    return -(-a // b)


def _round_up(x, n):
    return ((x + n - 1) // n) * n


def _vmem_capacity_bytes():
    try:
        return int(pltpu.get_tpu_info().vmem_capacity_bytes)
    except Exception:
        return 64 << 20  # conservative fallback (v7x per-TC VMEM)


def _num_tensorcores():
    try:
        kind = jax.devices()[0].device_kind.lower()
    except Exception:
        return 1
    return 2 if ("v7" in kind or "7x" in kind) else 1


def _largest_aligned_divisor(n, align, max_bytes, bytes_per_unit):
    """Largest multiple of `align` dividing `n` whose tile fits `max_bytes`."""
    t = (n // align) * align
    while t > align:
        if n % t == 0 and t * bytes_per_unit <= max_bytes:
            return t
        t -= align
    return align


# --------------------------------------------------------------------------- #
# Kernels
# --------------------------------------------------------------------------- #
def _linear_kernel_single_k(x_ref, w_ref, b_ref, o_ref, *, precision):
    # x_ref: (tm, K); w_ref: (tn, K) [PyTorch layout, contracted on last dim];
    # b_ref: (1, tn); o_ref: (tm, tn).  No accumulator scratch: single K step.
    acc = lax.dot_general(
        x_ref[...], w_ref[...],
        dimension_numbers=(((1,), (1,)), ((), ())),
        preferred_element_type=jnp.float32,
        precision=precision,
    )
    o_ref[...] = (acc + b_ref[...].astype(jnp.float32)).astype(o_ref.dtype)


def _linear_kernel_multi_k(x_ref, w_ref, b_ref, o_ref, acc_ref, *, precision):
    # Tiled-K reduction with an f32 VMEM accumulator (no separate zero pass).
    k = pl.program_id(2)
    partial = lax.dot_general(
        x_ref[...], w_ref[...],
        dimension_numbers=(((1,), (1,)), ((), ())),
        preferred_element_type=jnp.float32,
        precision=precision,
    )

    @pl.when(k == 0)
    def _():
        acc_ref[...] = partial

    @pl.when(k != 0)
    def _():
        acc_ref[...] += partial

    @pl.when(k == pl.num_programs(2) - 1)
    def _():
        o_ref[...] = (acc_ref[...] + b_ref[...].astype(jnp.float32)).astype(o_ref.dtype)


# --------------------------------------------------------------------------- #
# Wrapper
# --------------------------------------------------------------------------- #
@functools.partial(jax.jit, static_argnames=("tm", "tn", "tk", "compute_dtype"))
def prior_embedding_forward(x, weight, bias, *, tm=None, tn=None, tk=None,
                            compute_dtype=None):
    """y = x @ weight.T + bias.

    x: (..., d_in); weight: (d_model, d_in) [PyTorch nn.Linear layout];
    bias: (d_model,).  compute_dtype (e.g. jnp.bfloat16) casts the MXU inputs
    in the wrapper (accumulation stays f32); default None keeps fp32 numerics.
    """
    d_in = x.shape[-1]
    d_model, d_in_w = weight.shape
    assert d_in_w == d_in, "weight must be (d_model, d_in)"
    lead = x.shape[:-1]
    m = int(math.prod(lead)) if lead else 1
    out_dtype = x.dtype

    x2 = x.reshape(m, d_in)
    w2 = weight
    b1 = bias

    # Optional low-precision MXU inputs — cast here so VMEM tiles / DMA really
    # shrink (not re-cast per grid step inside the kernel).
    if compute_dtype is not None:
        cd = jax.dtypes.canonicalize_dtype(compute_dtype)
        if x2.dtype != cd:
            x2 = x2.astype(cd)
        if w2.dtype != cd:
            w2 = w2.astype(cd)

    # ---- N padding: keep the output last dim a multiple of 128 (lane-dense). -
    n_pad = _round_up(d_model, 128)
    if n_pad != d_model:
        w2 = jnp.pad(w2, ((0, n_pad - d_model), (0, 0)))
        b1 = jnp.pad(b1, (0, n_pad - d_model))
    b2 = b1.reshape(1, n_pad)

    xb = x2.dtype.itemsize
    wb = w2.dtype.itemsize
    bb = b2.dtype.itemsize
    ob = jnp.dtype(out_dtype).itemsize

    # ---- Generation-aware VMEM budget (v7x 64 MiB/TC, v5e/v6e 128 MiB). ------
    vmem_cap = _vmem_capacity_bytes()
    vmem_budget = max(32 << 20, (vmem_cap * 5) // 8)   # ~40 MiB v7x, ~80 MiB v6e

    # ---- K tiling. ------------------------------------------------------------
    MAX_SINGLE_K = 2048
    weight_resident = (tn is None and tk is None
                       and 2 * n_pad * d_in * wb <= vmem_budget // 3)
    k_pad = d_in
    if tk is None:
        if weight_resident or d_in <= MAX_SINGLE_K:
            tk = d_in                                   # single K step, no padding
        else:
            tk = 0
            t = min(MAX_SINGLE_K, (d_in // 128) * 128)
            while t >= 128:                             # 128-multiple divisor of d_in
                if d_in % t == 0:
                    tk = t
                    break
                t -= 128
            if tk == 0:                                 # fall back to zero-padded K
                k_pad = _round_up(d_in, 128)
                for cand in (2048, 1024, 512, 256, 128):
                    if k_pad % cand == 0:
                        tk = cand
                        break
    elif d_in % tk != 0:
        k_pad = _round_up(d_in, tk)
    if k_pad != d_in:
        # Zero-pad so no garbage enters the reduction (one extra HBM pass; only
        # taken when d_in has no usable 128-multiple divisor).
        x2 = jnp.pad(x2, ((0, 0), (0, k_pad - d_in)))
        w2 = jnp.pad(w2, ((0, 0), (0, k_pad - d_in)))
    k_steps = k_pad // tk

    # ---- N tiling. ------------------------------------------------------------
    if tn is None:
        if weight_resident:
            tn = n_pad                                  # W DMA'd once, stays in VMEM
        else:
            tn = _largest_aligned_divisor(n_pad, 128, vmem_budget // 3, 2 * tk * wb)
    assert n_pad % tn == 0

    # ---- M tiling: size from remaining VMEM; balance partial blocks. ----------
    w_tile_bytes = 2 * tn * tk * wb
    bias_bytes = 2 * tn * bb
    per_row = 2 * tk * xb + 2 * tn * ob + (tn * 4 if k_steps > 1 else 0)
    tm_by_vmem = max(8, (vmem_budget - w_tile_bytes - bias_bytes) // max(per_row, 1))
    tm_cap = max(8, min(tm_by_vmem, 1024 if xb <= 2 else 512))

    if tm is None:
        n_m_steps = _cdiv(m, tm_cap)
        if (n_m_steps == 1 and _num_tensorcores() >= 2
                and n_pad // tn == 1 and m >= 256):
            n_m_steps = 2            # give the second v7x TensorCore work to shard
        if n_m_steps == 1:
            tm = m
        else:
            tm = _round_up(_cdiv(m, n_m_steps), 8)
            if _round_up(tm, 128) <= tm_cap:
                tm = _round_up(tm, 128)

    m_steps = _cdiv(m, tm)
    n_steps = n_pad // tn
    grid_shape = (m_steps, n_steps) if k_steps == 1 else (m_steps, n_steps, k_steps)

    precision = lax.Precision.HIGHEST if x2.dtype == jnp.float32 else None

    vmem_est = (2 * tm * tk * xb + w_tile_bytes + bias_bytes + 2 * tm * tn * ob
                + (tm * tn * 4 if k_steps > 1 else 0))
    vmem_limit = int(min(vmem_budget + (8 << 20),
                         max(vmem_est + (8 << 20), 24 << 20)))

    cost = pl.CostEstimate(
        flops=2 * m * d_in * d_model,
        transcendentals=0,
        bytes_accessed=(m * k_pad * xb + n_pad * k_pad * wb + n_pad * bb
                        + m * n_pad * ob),
    )

    if k_steps == 1:
        kernel = functools.partial(_linear_kernel_single_k, precision=precision)
        in_specs = [
            pl.BlockSpec((tm, tk), lambda i, j: (i, 0)),     # x tile
            pl.BlockSpec((tn, tk), lambda i, j: (j, 0)),     # W tile (PyTorch layout)
            pl.BlockSpec((1, tn), lambda i, j: (0, j)),      # bias tile
        ]
        out_specs = pl.BlockSpec((tm, tn), lambda i, j: (i, j))
        scratch_shapes = []
        dims = ("parallel", "parallel")
    else:
        kernel = functools.partial(_linear_kernel_multi_k, precision=precision)
        in_specs = [
            pl.BlockSpec((tm, tk), lambda i, j, k: (i, k)),
            pl.BlockSpec((tn, tk), lambda i, j, k: (j, k)),
            pl.BlockSpec((1, tn), lambda i, j, k: (0, j)),
        ]
        out_specs = pl.BlockSpec((tm, tn), lambda i, j, k: (i, j))
        scratch_shapes = [pltpu.VMEM((tm, tn), jnp.float32)]
        dims = ("parallel", "parallel", "arbitrary")

    out2 = pl.pallas_call(
        kernel,
        out_shape=jax.ShapeDtypeStruct((m, n_pad), out_dtype),
        grid_spec=pltpu.PrefetchScalarGridSpec(
            num_scalar_prefetch=0,
            grid=grid_shape,
            in_specs=in_specs,
            out_specs=out_specs,
            scratch_shapes=scratch_shapes,
        ),
        compiler_params=pltpu.CompilerParams(
            dimension_semantics=dims,
            vmem_limit_bytes=vmem_limit,
        ),
        cost_estimate=cost,
    )(x2, w2, b2)

    if n_pad != d_model:
        out2 = out2[:, :d_model]
    return out2.reshape(*lead, d_model)


def init_prior_embedding_params(key, d_in, d_model, dtype=jnp.float32):
    """Deterministic synthetic init matching nn.Linear(d_in, d_model) shapes."""
    k_w, k_b = jax.random.split(key)
    bound = 1.0 / (d_in ** 0.5)
    weight = jax.random.uniform(k_w, (d_model, d_in), dtype, -bound, bound)
    bias = jax.random.uniform(k_b, (d_model,), dtype, -bound, bound)
    return weight, bias


if __name__ == "__main__":
    key = jax.random.PRNGKey(0)
    k_x, k_p, k_x2, k_p2 = jax.random.split(key, 4)

    # Case 1: the module's toy shape (d_model=64 is padded to 128 internally,
    # weight-resident single-K path, no accumulator scratch).
    batch, seq, d_in, d_model = 2, 8, 32, 64
    x = jax.random.normal(k_x, (batch, seq, d_in), dtype=jnp.float32)
    weight, bias = init_prior_embedding_params(k_p, d_in, d_model)
    y = jax.block_until_ready(prior_embedding_forward(x, weight, bias))
    y_ref = x @ weight.T + bias
    assert y.shape == (batch, seq, d_model)
    assert jnp.allclose(y, y_ref, atol=1e-5, rtol=1e-5)

    # Case 2: unaligned shapes exercising M tiling (balanced partial blocks) +
    # N padding, still single-K / weight-resident.
    batch2, seq2, d_in2, d_model2 = 4, 160, 96, 384
    x2 = jax.random.normal(k_x2, (batch2, seq2, d_in2), dtype=jnp.float32)
    w2, b2 = init_prior_embedding_params(k_p2, d_in2, d_model2)
    y2 = jax.block_until_ready(prior_embedding_forward(x2, w2, b2))
    y2_ref = jnp.einsum("bsd,md->bsm", x2, w2,
                        precision=jax.lax.Precision.HIGHEST) + b2
    assert y2.shape == (batch2, seq2, d_model2)
    assert jnp.allclose(y2, y2_ref, atol=1e-4, rtol=1e-4)

    print("KERNEL_OK")
</pallas_src>

<mosaic_0001>
module attributes {stable_mosaic.version = 11 : i64} {
  func.func @_linear_kernel_single_k(%arg0: i32, %arg1: i32, %arg2: memref<16x32xf32, #tpu.memory_space<vmem>>, %arg3: memref<128x32xf32, #tpu.memory_space<vmem>>, %arg4: memref<1x128xf32, #tpu.memory_space<vmem>>, %arg5: memref<16x128xf32, #tpu.memory_space<vmem>>) attributes {dimension_semantics = [#tpu.dimension_semantics<parallel>, #tpu.dimension_semantics<parallel>], iteration_bounds = array<i64: 1, 1>, scalar_prefetch = 0 : i64, scratch_operands = 0 : i64, tpu.core_type = #tpu.core_type<tc>, window_params = [{transform_indices = @transform_0, window_bounds = array<i64: 16, 32>}, {transform_indices = @transform_1, window_bounds = array<i64: 128, 32>}, {transform_indices = @transform_2, window_bounds = array<i64: 1, 128>}, {transform_indices = @transform_3, window_bounds = array<i64: 16, 128>}]} {
    %c0 = arith.constant 0 : index
    %c0_0 = arith.constant 0 : index
    %0 = vector.load %arg2[%c0, %c0_0] : memref<16x32xf32, #tpu.memory_space<vmem>>, vector<16x32xf32>
    %c0_1 = arith.constant 0 : index
    %c0_2 = arith.constant 0 : index
    %1 = vector.load %arg3[%c0_1, %c0_2] : memref<128x32xf32, #tpu.memory_space<vmem>>, vector<128x32xf32>
    %cst = arith.constant dense<0.000000e+00> : vector<16x128xf32>
    %2 = tpu.matmul %0, %1, %cst {dimension_numbers = #tpu.dot_dimension_numbers<[1], [1], [0], [0], [0, 0, 1, 0], [], []>, precision = #tpu.contract_precision<fp32>} : vector<16x32xf32>, vector<128x32xf32>, vector<16x128xf32> -> vector<16x128xf32>
    %c0_3 = arith.constant 0 : index
    %c0_4 = arith.constant 0 : index
    %3 = vector.load %arg4[%c0_3, %c0_4] : memref<1x128xf32, #tpu.memory_space<vmem>>, vector<1x128xf32>
    %4 = vector.broadcast %3 : vector<1x128xf32> to vector<16x128xf32>
    %5 = arith.addf %2, %4 : vector<16x128xf32>
    %c0_5 = arith.constant 0 : index
    %c0_6 = arith.constant 0 : index
    %6 = vector.load %arg5[%c0_5, %c0_6] : memref<16x128xf32, #tpu.memory_space<vmem>>, vector<16x128xf32>
    tpu.vector_store %arg5[%c0_5, %c0_6], %5 {strides = array<i32>} : memref<16x128xf32, #tpu.memory_space<vmem>>, vector<16x128xf32>,
    return
  }
  func.func @transform_0(%arg0: i32, %arg1: i32) -> (i32, i32) {
    %c0_i32 = arith.constant 0 : i32
    %c0_i32_0 = arith.constant 0 : i32
    return %arg0, %c0_i32 : i32, i32
  }
  func.func @transform_1(%arg0: i32, %arg1: i32) -> (i32, i32) {
    %c0_i32 = arith.constant 0 : i32
    %c0_i32_0 = arith.constant 0 : i32
    return %arg1, %c0_i32 : i32, i32
  }
  func.func @transform_2(%arg0: i32, %arg1: i32) -> (i32, i32) {
    %c0_i32 = arith.constant 0 : i32
    %c0_i32_0 = arith.constant 0 : i32
    return %c0_i32, %arg1 : i32, i32
  }
  func.func @transform_3(%arg0: i32, %arg1: i32) -> (i32, i32) {
    %c0_i32 = arith.constant 0 : i32
    return %arg0, %arg1 : i32, i32
  }
}

</mosaic_0001>

<bundles_post_ra>
// kernel: prior_embedding_forward.1
= control target key start
LH: loop header
LB: loop body
LE: loop exit
PB: predicated region body
PF: predicated region fallthrough
CT: control target
= control target key end

     0   :  { %vm36_vm0 = vcmask 261120   ;;  %s801_s1 = inlined_call_operand.vmem [shape: f32[128,32], index: 1, kind: input, shape index: {}]   ;;  %s802_s2 = inlined_call_operand.vmem [shape: f32[1,128], index: 2, kind: input, shape index: {}]   ;;  %s803_s0 = inlined_call_operand.vmem [shape: f32[16,32], index: 0, kind: input, shape index: {}]   ;;  %s804_s3 = inlined_call_operand.vmem [shape: f32[16,128], index: 3, kind: output, shape index: {}]  }
   0x1   :  { %v31_v0 = vld [vmem:[%s801_s1 + $0x78] sm:$0xff]  ;;  %v30_v1 = vld [vmem:[%s801_s1 + $0x70] sm:$0xff]  ;;  %v29_v2 = vld [vmem:[%s801_s1 + $0x68] sm:$0xff] }
   0x2   :  { %v89_v3 = vsel %vm36_vm0, %v31_v0, 0  ;;  %v86_v4 = vsel %vm36_vm0, %v30_v1, 0  ;;  %v83_v5 = vsel %vm36_vm0, %v29_v2, 0  ;;  %v28_v6 = vld [vmem:[%s801_s1 + $0x60] sm:$0xff]  ;;  %v27_v7 = vld [vmem:[%s801_s1 + $0x58] sm:$0xff]  ;;  %v26_v17 = vld [vmem:[%s801_s1 + $0x50] sm:$0xff] }
   0x3   :  { %v540_v8 = vand.u32 4294901760, %v89_v3  ;;  %v542_v9 = vand.u32 4294901760, %v86_v4  ;;  %v544_v10 = vand.u32 4294901760, %v83_v5  ;;  %v80_v11 = vsel %vm36_vm0, %v28_v6, 0  ;;  %v25_v26 = vld [vmem:[%s801_s1 + $0x48] sm:$0xff]  ;;  %v24_v34 = vld [vmem:[%s801_s1 + $0x40] sm:$0xff] }
   0x4   :  { %v547_v12 = vand.u32 4294901760, %v80_v11  ;;  %v77_v16 = vsel %vm36_vm0, %v27_v7, 0  ;;  %v74_v21 = vsel %vm36_vm0, %v26_v17, 0  ;;  %v71_v29 = vsel %vm36_vm0, %v25_v26, 0  ;;  %v23_v41 = vld [vmem:[%s801_s1 + $0x38] sm:$0xff]  ;;  %v22_v48 = vld [vmem:[%s801_s1 + $0x30] sm:$0xff] }
   0x5   :  { %92 = vmatpush.xpose.msra.mxu0 %v540_v8  ;;  %v141_v13 = vsub.f32 %v89_v3, %v540_v8  ;;  %305 = vmatpush.xpose.msra.mxu3 %v540_v8  ;;  %v147_v14 = vsub.f32 %v86_v4, %v542_v9  ;;  %v153_v15 = vsub.f32 %v83_v5, %v544_v10  ;;  %v562_v20 = vand.u32 4294901760, %v77_v16  ;;  %v21_v54 = vld [vmem:[%s801_s1 + $0x28] sm:$0xff]  ;;  %v20_v62 = vld [vmem:[%s801_s1 + $0x20] sm:$0xff]  ;;  %v19_v5 = vld [vmem:[%s801_s1 + $0x18] sm:$0xff] }
   0x6   :  { %v159_v24 = vsub.f32 %v80_v11, %v547_v12  ;;  %v575_v28 = vand.u32 4294901760, %v74_v21  ;;  %v587_v35 = vand.u32 4294901760, %v71_v29  ;;  %v68_v36 = vsel %vm36_vm0, %v24_v34, 0 }
   0x7   :  { %247 = vmatpush.xpose.msra.mxu2 %v141_v13  ;;  %v558_v18 = vand.u32 4294901760, %v141_v13  ;;  %v560_v19 = vand.u32 4294901760, %v147_v14  ;;  %v570_v25 = vand.u32 4294901760, %v153_v15  ;;  %v165_v32 = vsub.f32 %v77_v16, %v562_v20  ;;  %v18_v16 = vld [vmem:[%s801_s1 + $0x10] sm:$0xff] }
   0x8   :  { %v581_v33 = vand.u32 4294901760, %v159_v24  ;;  %v171_v39 = vsub.f32 %v74_v21, %v575_v28  ;;  %v599_v42 = vand.u32 4294901760, %v68_v36  ;;  %v177_v45 = vsub.f32 %v71_v29, %v587_v35 }
   0x9   :  { %94 = vmatpush.xpose.msra.mxu0 %v542_v9  ;;  %v143_v22 = vsub.f32 %v141_v13, %v558_v18  ;;  %307 = vmatpush.xpose.msra.mxu3 %v542_v9  ;;  %v149_v23 = vsub.f32 %v147_v14, %v560_v19  ;;  %v155_v31 = vsub.f32 %v153_v15, %v570_v25  ;;  %v593_v40 = vand.u32 4294901760, %v165_v32 }
   0xa   :  { %v161_v38 = vsub.f32 %v159_v24, %v581_v33  ;;  %v604_v46 = vand.u32 4294901760, %v171_v39  ;;  %v65_v47 = vsel %vm36_vm0, %v23_v41, 0  ;;  %v183_v49 = vsub.f32 %v68_v36, %v599_v42 }
   0xb   :  { %250 = vmatpush.xpose.msra.mxu2 %v147_v14  ;;  %v144_v27 = vand.u32 4294901760, %v143_v22  ;;  %v150_v30 = vand.u32 4294901760, %v149_v23  ;;  %v156_v37 = vand.u32 4294901760, %v155_v31  ;;  %v167_v44 = vsub.f32 %v165_v32, %v593_v40 }
   0xc   :  { %v162_v43 = vand.u32 4294901760, %v161_v38  ;;  %v173_v51 = vsub.f32 %v171_v39, %v604_v46  ;;  %v614_v52 = vand.u32 4294901760, %v65_v47  ;;  %v616_v53 = vand.u32 4294901760, %v177_v45 }
   0xd   :  { %96 = vmatpush.xpose.msra.mxu0 %v544_v10  ;;  %145 = vmatpush.xpose.msra.mxu1 %v144_v27  ;;  %v168_v50 = vand.u32 4294901760, %v167_v44  ;;  %v62_v55 = vsel %vm36_vm0, %v22_v48, 0  ;;  %v623_v56 = vand.u32 4294901760, %v183_v49  ;;  %v59_v57 = vsel %vm36_vm0, %v21_v54, 0  ;;  %v17_v27 = vld [vmem:[%s801_s1 + $0x8] sm:$0xff] }
   0xe   :  { %309 = vmatpush.xpose.msra.mxu3 %v544_v10  ;;  %v174_v58 = vand.u32 4294901760, %v173_v51  ;;  %v179_v59 = vsub.f32 %v177_v45, %v616_v53  ;;  %v189_v60 = vsub.f32 %v65_v47, %v614_v52  ;;  %v629_v61 = vand.u32 4294901760, %v62_v55 }
   0xf   :  { %253 = vmatpush.xpose.msra.mxu2 %v153_v15  ;;  %v185_v63 = vsub.f32 %v183_v49, %v623_v56  ;;  %v636_v0 = vand.u32 4294901760, %v59_v57  ;;  %v56_v4 = vsel %vm36_vm0, %v20_v62, 0  ;;  %v53_v15 = vsel %vm36_vm0, %v19_v5, 0 }
  0x10   :  { %v180_v1 = vand.u32 4294901760, %v179_v59  ;;  %v195_v2 = vsub.f32 %v62_v55, %v629_v61  ;;  %v640_v3 = vand.u32 4294901760, %v189_v60  ;;  %v647_v6 = vand.u32 4294901760, %v56_v4 }
  0x11   :  { %98 = vmatpush.xpose.msra.mxu0 %v547_v12  ;;  %151 = vmatpush.xpose.msra.mxu1 %v150_v30  ;;  %v186_v7 = vand.u32 4294901760, %v185_v63  ;;  %v201_v13 = vsub.f32 %v59_v57, %v636_v0  ;;  %v662_v23 = vand.u32 4294901760, %v53_v15  ;;  %v50_v26 = vsel %vm36_vm0, %v18_v16, 0 }
  0x12   :  { %311 = vmatpush.xpose.msra.mxu3 %v547_v12  ;;  %v191_v11 = vsub.f32 %v189_v60, %v640_v3  ;;  %v652_v14 = vand.u32 4294901760, %v195_v2  ;;  %v207_v17 = vsub.f32 %v56_v4, %v647_v6  ;;  %v676_v34 = vand.u32 4294901760, %v50_v26  ;;  %v14_v4 = vld [vmem:[%s803_s0] sm:$0xff] }
  0x13   :  { %256 = vmatpush.xpose.msra.mxu2 %v159_v24  ;;  %v664_v24 = vand.u32 4294901760, %v201_v13  ;;  %v47_v36 = vsel %vm36_vm0, %v17_v27, 0  ;;  %v38_v5 = vsel %vm36_vm0, %v14_v4, 0 }
  0x14   :  { %v192_v21 = vand.u32 4294901760, %v191_v11  ;;  %v197_v22 = vsub.f32 %v195_v2, %v652_v14  ;;  %v671_v29 = vand.u32 4294901760, %v207_v17  ;;  %v219_v41 = vsub.f32 %v50_v26, %v676_v34 }
  0x15   :  { %100 = vmatpush.xpose.msra.mxu0 %v562_v20  ;;  %157 = vmatpush.xpose.msra.mxu1 %v156_v37  ;;  %v203_v31 = vsub.f32 %v201_v13, %v664_v24  ;;  %v16_v37 = vld [vmem:[%s801_s1] sm:$0xff] }
  0x16   :  { %313 = vmatpush.xpose.msra.mxu3 %v562_v20  ;;  %v198_v30 = vand.u32 4294901760, %v197_v22  ;;  %v209_v38 = vsub.f32 %v207_v17, %v671_v29  ;;  %v697_v51 = vand.u32 4294901760, %v219_v41 }
  0x17   :  { %259 = vmatpush.xpose.msra.mxu2 %v165_v32  ;;  %v213_v32 = vsub.f32 %v53_v15, %v662_v23 }
  0x18   :  { %v210_v47 = vand.u32 4294901760, %v209_v38  ;;  %v221_v55 = vsub.f32 %v219_v41, %v697_v51 }
  0x19   :  { %102 = vmatpush.xpose.msra.mxu0 %v575_v28  ;;  %163 = vmatpush.xpose.msra.mxu1 %v162_v43  ;;  %v686_v43 = vand.u32 4294901760, %v47_v36  ;;  %v688_v44 = vand.u32 4294901760, %v213_v32 }
  0x1a   :  { %315 = vmatpush.xpose.msra.mxu3 %v575_v28  ;;  %v222_v59 = vand.u32 4294901760, %v221_v55 }
  0x1b   :  { %262 = vmatpush.xpose.msra.mxu2 %v171_v39  ;;  %v204_v39 = vand.u32 4294901760, %v203_v31  ;;  %v215_v48 = vsub.f32 %v213_v32, %v688_v44 }
  0x1d   :  { %104 = vmatpush.xpose.msra.mxu0 %v587_v35  ;;  %169 = vmatpush.xpose.msra.mxu1 %v168_v50  ;;  %v216_v54 = vand.u32 4294901760, %v215_v48 }
  0x1e   :  { %317 = vmatpush.xpose.msra.mxu3 %v587_v35 }
  0x1f   :  { %265 = vmatpush.xpose.msra.mxu2 %v177_v45  ;;  %v44_v45 = vsel %vm36_vm0, %v16_v37, 0 }
  0x20   :  { %v695_v50 = vand.u32 4294901760, %v44_v45 }
  0x21   :  { %106 = vmatpush.xpose.msra.mxu0 %v599_v42  ;;  %175 = vmatpush.xpose.msra.mxu1 %v174_v58 }
  0x22   :  { %319 = vmatpush.xpose.msra.mxu3 %v599_v42  ;;  %v231_v57 = vsub.f32 %v44_v45, %v695_v50 }
  0x23   :  { %268 = vmatpush.xpose.msra.mxu2 %v183_v49  ;;  %v225_v49 = vsub.f32 %v47_v36, %v686_v43 }
  0x24   :  { %v708_v62 = vand.u32 4294901760, %v231_v57 }
  0x25   :  { %108 = vmatpush.xpose.msra.mxu0 %v614_v52  ;;  %181 = vmatpush.xpose.msra.mxu1 %v180_v1  ;;  %v703_v58 = vand.u32 4294901760, %v225_v49 }
  0x26   :  { %321 = vmatpush.xpose.msra.mxu3 %v614_v52  ;;  %v233_v1 = vsub.f32 %v231_v57, %v708_v62 }
  0x27   :  { %271 = vmatpush.xpose.msra.mxu2 %v189_v60  ;;  %v227_v60 = vsub.f32 %v225_v49, %v703_v58 }
  0x29   :  { %110 = vmatpush.xpose.msra.mxu0 %v629_v61  ;;  %187 = vmatpush.xpose.msra.mxu1 %v186_v7  ;;  %v228_v63 = vand.u32 4294901760, %v227_v60  ;;  %v723_v7 = vand.u32 4294901760, %v38_v5 }
  0x2a   :  { %323 = vmatpush.xpose.msra.mxu3 %v629_v61 }
  0x2b   :  { %274 = vmatpush.xpose.msra.mxu2 %v195_v2  ;;  %v234_v2 = vand.u32 4294901760, %v233_v1  ;;  %v124_v11 = vsub.f32 %v38_v5, %v723_v7 }
  0x2d   :  { %112 = vmatpush.xpose.msra.mxu0 %v636_v0  ;;  %193 = vmatpush.xpose.msra.mxu1 %v192_v21 }
  0x2e   :  { %325 = vmatpush.xpose.msra.mxu3 %v636_v0 }
  0x2f   :  { %277 = vmatpush.xpose.msra.mxu2 %v201_v13 }
  0x31   :  { %114 = vmatpush.xpose.msra.mxu0 %v647_v6  ;;  %199 = vmatpush.xpose.msra.mxu1 %v198_v30 }
  0x32   :  { %327 = vmatpush.xpose.msra.mxu3 %v647_v6 }
  0x33   :  { %280 = vmatpush.xpose.msra.mxu2 %v207_v17 }
  0x35   :  { %116 = vmatpush.xpose.msra.mxu0 %v662_v23  ;;  %205 = vmatpush.xpose.msra.mxu1 %v204_v39 }
  0x36   :  { %329 = vmatpush.xpose.msra.mxu3 %v662_v23 }
  0x37   :  { %283 = vmatpush.xpose.msra.mxu2 %v213_v32 }
  0x39   :  { %118 = vmatpush.xpose.msra.mxu0 %v676_v34  ;;  %211 = vmatpush.xpose.msra.mxu1 %v210_v47 }
  0x3a   :  { %331 = vmatpush.xpose.msra.mxu3 %v676_v34 }
  0x3b   :  { %286 = vmatpush.xpose.msra.mxu2 %v219_v41 }
  0x3d   :  { %120 = vmatpush.xpose.msra.mxu0 %v686_v43  ;;  %217 = vmatpush.xpose.msra.mxu1 %v216_v54 }
  0x3e   :  { %333 = vmatpush.xpose.msra.mxu3 %v686_v43 }
  0x3f   :  { %289 = vmatpush.xpose.msra.mxu2 %v225_v49 }
  0x41   :  { %122 = vmatpush.xpose.msra.mxu0 %v695_v50  ;;  %223 = vmatpush.xpose.msra.mxu1 %v222_v59 }
  0x42   :  { %335 = vmatpush.xpose.msra.mxu3 %v695_v50 }
  0x43   :  { %292 = vmatpush.xpose.msra.mxu2 %v231_v57 }
  0x45   :  { %352 = vmatpush.xpose.msrb.mxu0 %v558_v18  ;;  %229 = vmatpush.xpose.msra.mxu1 %v228_v63 }
  0x46   :  { %485 = vmatpush.xpose.msrb.mxu3 %v540_v8  ;;  %295 = vmatmul.f32.vlgmr.msra.gmra.mxu2 %v124_v11 }
  0x47   :  { %469 = vmatpush.xpose.msrb.mxu2 %v558_v18  ;;  %v125_v18 = vand.u32 4294901760, %v124_v11 }
  0x49   :  { %356 = vmatpush.xpose.msrb.mxu0 %v560_v19  ;;  %235 = vmatpush.xpose.msra.mxu1 %v234_v2  ;;  %v126_v13 = vsub.f32 %v124_v11, %v125_v18 }
  0x4a   :  { %486 = vmatpush.xpose.msrb.mxu3 %v542_v9 }
  0x4b   :  { %470 = vmatpush.xpose.msrb.mxu2 %v560_v19  ;;  %339 = vmatmul.f32.vlgmr.msra.gmra.mxu3 %v125_v18  ;;  %v15_v19 = vld [vmem:[%s803_s0 + $0x8] sm:$0xff]  ;;  %v127_v15 = vand.u32 4294901760, %v126_v13 }
  0x4c   :  { %237 = vmatmul.f32.vlgmr.msra.gmra.mxu1 %v723_v7 }
  0x4d   :  { %360 = vmatpush.xpose.msrb.mxu0 %v570_v25  ;;  %423 = vmatpush.xpose.msrb.mxu1 %v540_v8  ;;  %v41_v8 = vsel %vm36_vm0, %v15_v19, 0 }
  0x4e   :  { %487 = vmatpush.xpose.msrb.mxu3 %v544_v10  ;;  %v131_v16 = vand.u32 4294901760, %v41_v8  ;;  %128 = vmatmul.f32.vlgmr.msra.gmra.mxu0 %v127_v15 }
  0x4f   :  { %471 = vmatpush.xpose.msrb.mxu2 %v570_v25 }
  0x50   :  { %v132_v25 = vsub.f32 %v41_v8, %v131_v16 }
  0x51   :  { %364 = vmatpush.xpose.msrb.mxu0 %v581_v33  ;;  %425 = vmatpush.xpose.msrb.mxu1 %v542_v9 }
  0x52   :  { %488 = vmatpush.xpose.msrb.mxu3 %v547_v12  ;;  %v133_v17 = vand.u32 4294901760, %v132_v25  ;;  %300 = vmatmul.f32.gmra.mxu2 %v132_v25 }
  0x53   :  { %472 = vmatpush.xpose.msrb.mxu2 %v581_v33 }
  0x54   :  { %241 = vmatmul.f32.gmra.mxu1 %v131_v16  ;;  %v134_v9 = vsub.f32 %v132_v25, %v133_v17  ;;  %345 = vmatmul.f32.gmra.mxu3 %v133_v17 }
  0x55   :  { %368 = vmatpush.xpose.msrb.mxu0 %v593_v40  ;;  %427 = vmatpush.xpose.msrb.mxu1 %v544_v10 }
  0x56   :  { %489 = vmatpush.xpose.msrb.mxu3 %v562_v20  ;;  %v135_v33 = vand.u32 4294901760, %v134_v9 }
  0x57   :  { %473 = vmatpush.xpose.msrb.mxu2 %v593_v40 }
  0x58   :  { %136 = vmatmul.f32.gmra.mxu0 %v135_v33 }
  0x59   :  { %372 = vmatpush.xpose.msrb.mxu0 %v604_v46  ;;  %429 = vmatpush.xpose.msrb.mxu1 %v547_v12 }
  0x5a   :  { %490 = vmatpush.xpose.msrb.mxu3 %v575_v28 }
  0x5b   :  { %474 = vmatpush.xpose.msrb.mxu2 %v604_v46 }
  0x5d   :  { %376 = vmatpush.xpose.msrb.mxu0 %v616_v53  ;;  %431 = vmatpush.xpose.msrb.mxu1 %v562_v20 }
  0x5e   :  { %491 = vmatpush.xpose.msrb.mxu3 %v587_v35 }
  0x5f   :  { %475 = vmatpush.xpose.msrb.mxu2 %v616_v53 }
  0x61   :  { %380 = vmatpush.xpose.msrb.mxu0 %v623_v56  ;;  %433 = vmatpush.xpose.msrb.mxu1 %v575_v28 }
  0x62   :  { %492 = vmatpush.xpose.msrb.mxu3 %v599_v42 }
  0x63   :  { %476 = vmatpush.xpose.msrb.mxu2 %v623_v56 }
  0x65   :  { %384 = vmatpush.xpose.msrb.mxu0 %v640_v3  ;;  %435 = vmatpush.xpose.msrb.mxu1 %v587_v35  ;;  %v501_v35 = vld [vmem:[%s802_s2] ss:$0 sm:$0xff] }
  0x66   :  { %493 = vmatpush.xpose.msrb.mxu3 %v614_v52 }
  0x67   :  { %477 = vmatpush.xpose.msrb.mxu2 %v640_v3 }
  0x69   :  { %388 = vmatpush.xpose.msrb.mxu0 %v652_v14  ;;  %437 = vmatpush.xpose.msrb.mxu1 %v599_v42 }
  0x6a   :  { %494 = vmatpush.xpose.msrb.mxu3 %v629_v61 }
  0x6b   :  { %478 = vmatpush.xpose.msrb.mxu2 %v652_v14 }
  0x6d   :  { %392 = vmatpush.xpose.msrb.mxu0 %v664_v24  ;;  %439 = vmatpush.xpose.msrb.mxu1 %v614_v52 }
  0x6e   :  { %495 = vmatpush.xpose.msrb.mxu3 %v636_v0 }
  0x6f   :  { %479 = vmatpush.xpose.msrb.mxu2 %v664_v24 }
  0x71   :  { %396 = vmatpush.xpose.msrb.mxu0 %v671_v29  ;;  %441 = vmatpush.xpose.msrb.mxu1 %v629_v61 }
  0x72   :  { %496 = vmatpush.xpose.msrb.mxu3 %v647_v6 }
  0x73   :  { %480 = vmatpush.xpose.msrb.mxu2 %v671_v29 }
  0x75   :  { %400 = vmatpush.xpose.msrb.mxu0 %v688_v44  ;;  %443 = vmatpush.xpose.msrb.mxu1 %v636_v0 }
  0x76   :  { %497 = vmatpush.xpose.msrb.mxu3 %v662_v23 }
  0x77   :  { %481 = vmatpush.xpose.msrb.mxu2 %v688_v44 }
  0x79   :  { %404 = vmatpush.xpose.msrb.mxu0 %v697_v51  ;;  %445 = vmatpush.xpose.msrb.mxu1 %v647_v6 }
  0x7a   :  { %498 = vmatpush.xpose.msrb.mxu3 %v676_v34 }
  0x7b   :  { %482 = vmatpush.xpose.msrb.mxu2 %v697_v51 }
  0x7d   :  { %408 = vmatpush.xpose.msrb.mxu0 %v703_v58  ;;  %447 = vmatpush.xpose.msrb.mxu1 %v662_v23 }
  0x7e   :  { %499 = vmatpush.xpose.msrb.mxu3 %v686_v43 }
  0x7f   :  { %483 = vmatpush.xpose.msrb.mxu2 %v703_v58 }
  0x81   :  { %412 = vmatpush.xpose.msrb.mxu0 %v708_v62  ;;  %449 = vmatpush.xpose.msrb.mxu1 %v676_v34 }
  0x82   :  { %500 = vmatpush.xpose.msrb.mxu3 %v695_v50 }
  0x83   :  { %484 = vmatpush.xpose.msrb.mxu2 %v708_v62 }
  0x84   :  { %414 = vmatmul.f32.vlgmr.msrb.gmra.mxu0 %v723_v7 }
  0x85   :  { %451 = vmatpush.xpose.msrb.mxu1 %v686_v43  ;;  %459 = vmatmul.f32.vlgmr.msrb.gmra.mxu3 %v131_v16 }
  0x86   :  { %418 = vmatmul.f32.vlgmr.msrb.gmra.mxu2 %v131_v16 }
  0x89   :  { %453 = vmatpush.xpose.msrb.mxu1 %v695_v50 }
  0x8c   :  { %455 = vmatmul.f32.vlgmr.msrb.gmra.mxu1 %v723_v7 }
  0xc9   :  { %v238_v12 = vpop.f32.mrf.mxu1  ;;  %v296_v28 = vpop.f32.mrf.mxu2 }
  0xcb   :  { %v129_v10 = vpop.f32.mrf.mxu0 }
  0xcc   :  { %v130_v40 = vadd.f32 %v501_v35, %v129_v10 }
  0xce   :  { %v340_v20 = vpop.f32.mrf.mxu3  ;;  %v239_v53 = vadd.f32 %v238_v12, %v130_v40 }
  0xd0   :  { %v297_v3 = vadd.f32 %v296_v28, %v239_v53 }
  0xd1   :  { %v242_v52 = vpop.f32.mrf.mxu1 }
  0xd2   :  { %v341_v21 = vadd.f32 %v340_v20, %v297_v3 }
  0xd5   :  { %v137_v42 = vpop.f32.mrf.mxu0  ;;  %v301_v61 = vpop.f32.mrf.mxu2 }
  0xd6   :  { %v138_v46 = vadd.f32 %v501_v35, %v137_v42 }
  0xd7   :  { %v346_v56 = vpop.f32.mrf.mxu3 }
  0xd8   :  { %v243_v0 = vadd.f32 %v242_v52, %v138_v46 }
  0xda   :  { %v302_v6 = vadd.f32 %v301_v61, %v243_v0 }
  0xdc   :  { %v347_v23 = vadd.f32 %v346_v56, %v302_v6 }
 0x101   :  { %v415_v14 = vpop.f32.mrf.mxu0 }
 0x102   :  { %v416_v22 = vadd.f32 %v415_v14, %v341_v21 }
 0x108   :  { %v460_v24 = vpop.f32.mrf.mxu3 }
 0x109   :  { %v419_v26 = vpop.f32.mrf.mxu2  ;;  %v456_v27 = vpop.f32.mrf.mxu1 }
 0x10a   :  { %v420_v29 = vadd.f32 %v419_v26, %v347_v23  ;;  %v457_v30 = vadd.f32 %v456_v27, %v416_v22 }
 0x10c   :  { %463 = vst [vmem:[%s804_s3] sm:$0xff] %v457_v30  ;;  %v461_v31 = vadd.f32 %v460_v24, %v420_v29 }
 0x10e   :  { %464 = vst [vmem:[%s804_s3 + $0x8] sm:$0xff] %v461_v31 }

</bundles_post_ra>
